<compile_context>
chip_gen: v7x
topology: tpu7x:2x2x1
jax: 0.10.0
libtpu: 0.0.40
codegen_flags: <defaults>
</compile_context>

<pallas_src>
import functools

import jax
import jax.numpy as jnp
from jax.experimental import pallas as pl
from jax.experimental.pallas import tpu as pltpu


def input_highway_kernel(x_ref, w_ref, b_ref, y_ref):
    # One MXU push per grid step: (TM, K) @ (K, N) -> (TM, N), f32 accumulate,
    # bias add on the VPU, lane-dense store (N is a multiple of 128 for pack>=2).
    acc = jnp.dot(x_ref[...], w_ref[...], preferred_element_type=jnp.float32)
    y_ref[...] = (acc + b_ref[...]).astype(y_ref.dtype)


def prepare_fused_weights(params, input_dim, num_groups):
    """Host-side, run-once algebraic fusion of every linear piece of the module."""
    f32 = jnp.float32
    scales = params["highway_scales"].astype(f32)            # (D,)
    wv = params["w_v"].astype(f32)                            # (D, D)  v = h @ wv.T + bv
    bv = params["b_v"].astype(f32)                            # (D,)
    wo = params["w_o"].astype(f32)                            # (D, D)  o = v @ wo.T + bo
    bo = params["b_o"].astype(f32)                            # (D,)

    # o = ((x*scales) @ wv.T + bv) @ wo.T + bo  ==  x @ W_eff + b_eff
    w_eff = (scales[:, None] * wv.T) @ wo.T                   # (D, D)
    b_eff = bv @ wo.T + bo                                    # (D,)

    # Contiguous-partition group transforms as one block-diagonal matrix.
    wg = jax.scipy.linalg.block_diag(
        *[params["group_w"][i].astype(f32) for i in range(num_groups)]
    )                                                         # (D, D)

    w_cat = jnp.concatenate([w_eff, wg.T], axis=1)            # (D, 2D)
    b_cat = jnp.concatenate(
        [b_eff, jnp.zeros((input_dim,), f32)]
    ).reshape(1, 2 * input_dim)                               # (1, 2D), kept f32
    return w_cat, b_cat


@functools.partial(jax.jit, static_argnames=("input_dim", "num_groups", "tile_m"))
def input_highway_forward(x, w_cat, b_cat, *, input_dim, num_groups, tile_m=1024):
    """Runs the fused Pallas kernel and reassembles the PyTorch-style output dict."""
    B, D = x.shape
    assert D == input_dim
    dtype = x.dtype                     # native dtype in / out (no f32 upcast pass)

    # Row-packing factor: fold `pack` consecutive batch rows into one row so the
    # kernel's last dims are lane-dense (K = pack*D, N = pack*2D).
    pack = 8 if B % 8 == 0 else 4 if B % 4 == 0 else 2 if B % 2 == 0 else 1
    K = pack * D
    N = pack * 2 * D
    M = B // pack

    # Block-diag replicate the fused (D, 2D) weight `pack` times -> (K, N).
    # Tiny (<= 0.5 MiB f32) and shape-static; stays off the kernel's hot path.
    w_big = jnp.kron(jnp.eye(pack, dtype=jnp.float32), w_cat).astype(dtype)
    b_big = jnp.tile(b_cat, (1, pack))                        # (1, N), f32 accum bias

    x_packed = x.reshape(M, K)

    # Batch tiling over packed rows; ragged last block is clipped by Pallas
    # (no jnp.pad / output-slice copies).  tile_m=1024 packed rows == 8192
    # original rows per step on the pack=8 path.
    tm = M if M <= tile_m else tile_m
    grid = pl.cdiv(M, tm)

    y = pl.pallas_call(
        input_highway_kernel,
        grid=(grid,),
        in_specs=[
            pl.BlockSpec((tm, K), lambda i: (i, 0)),          # x: streamed over batch
            pl.BlockSpec((K, N), lambda i: (0, 0)),           # fused weight: VMEM-resident
            pl.BlockSpec((1, N), lambda i: (0, 0)),           # fused bias:   VMEM-resident
        ],
        out_specs=pl.BlockSpec((tm, N), lambda i: (i, 0)),
        out_shape=jax.ShapeDtypeStruct((M, N), dtype),
        compiler_params=pltpu.CompilerParams(
            dimension_semantics=("parallel",),                # megacore batch sharding (v7x)
        ),
    )(x_packed, w_big, b_big)

    y = y.reshape(B, 2 * D)
    highway = y[:, :D]
    groups_flat = y[:, D:]

    # Group splits stay inside this jit so XLA fuses them (no 16 separate
    # lane-width-2 store ops outside the compiled graph).
    g = D // num_groups
    groups_3d = groups_flat.reshape(B, num_groups, g)
    group_features = {
        f"group_{i}": groups_3d[:, i, :] for i in range(num_groups)
    }
    return {
        "highway": highway,
        # softmax over a single key is exactly 1 -> constant; no kernel output needed.
        "attention_weights": jnp.ones((B, 1, 1), dtype),
        "groups": group_features,
    }


if __name__ == "__main__":
    B, D = 8, 32            # input_dim=32 -> num_heads=8, 16 groups of size 2
    NUM_GROUPS = 16
    g = D // NUM_GROUPS

    key = jax.random.PRNGKey(0)
    kx, kwv, kbv, kwo, kbo, kgw = jax.random.split(key, 6)

    x = jax.random.normal(kx, (B, D), jnp.float32)

    params = {
        "highway_scales": jnp.ones((D,), jnp.float32),                 # nn.Parameter(ones)
        "w_v": 0.05 * jax.random.normal(kwv, (D, D), jnp.float32),     # in_proj value slice
        "b_v": 0.05 * jax.random.normal(kbv, (D,), jnp.float32),
        "w_o": 0.05 * jax.random.normal(kwo, (D, D), jnp.float32),     # out_proj
        "b_o": 0.05 * jax.random.normal(kbo, (D,), jnp.float32),
        # group transforms init to identity (nn.init.eye_) plus a perturbation so the
        # block-diagonal fusion path is actually exercised by the check below.
        "group_w": jnp.stack([jnp.eye(g, dtype=jnp.float32)] * NUM_GROUPS)
        + 0.01 * jax.random.normal(kgw, (NUM_GROUPS, g, g), jnp.float32),
    }

    # Run-once weight fusion (hoisted out of the forward path).
    w_cat, b_cat = prepare_fused_weights(params, D, NUM_GROUPS)
    w_cat, b_cat = jax.block_until_ready((w_cat, b_cat))

    out = input_highway_forward(
        x, w_cat, b_cat, input_dim=D, num_groups=NUM_GROUPS
    )
    jax.block_until_ready(out)

    # Pure-JAX reference check (mirrors the PyTorch forward exactly).
    h_ref = x * params["highway_scales"][None, :]
    v_ref = h_ref @ params["w_v"].T + params["b_v"][None, :]
    hw_ref = v_ref @ params["w_o"].T + params["b_o"][None, :]
    assert jnp.allclose(out["highway"], hw_ref, atol=1e-5)
    assert jnp.allclose(out["attention_weights"], jnp.ones((B, 1, 1)))
    for i in range(NUM_GROUPS):
        grp_ref = x[:, i * g:(i + 1) * g] @ params["group_w"][i].T
        assert jnp.allclose(out["groups"][f"group_{i}"], grp_ref, atol=1e-5)

    print("KERNEL_OK")
</pallas_src>

<mosaic_0001>
module attributes {stable_mosaic.version = 11 : i64} {
  func.func @input_highway_kernel(%arg0: i32, %arg1: memref<1x256xf32, #tpu.memory_space<vmem>>, %arg2: memref<256x512xf32, #tpu.memory_space<vmem>>, %arg3: memref<1x512xf32, #tpu.memory_space<vmem>>, %arg4: memref<1x512xf32, #tpu.memory_space<vmem>>) attributes {dimension_semantics = [#tpu.dimension_semantics<parallel>], iteration_bounds = array<i64: 1>, scalar_prefetch = 0 : i64, scratch_operands = 0 : i64, tpu.core_type = #tpu.core_type<tc>, window_params = [{transform_indices = @transform_0, window_bounds = array<i64: 1, 256>}, {pipeline_mode = #tpu.pipeline_mode<synchronous>, transform_indices = @transform_1, window_bounds = array<i64: 256, 512>}, {pipeline_mode = #tpu.pipeline_mode<synchronous>, transform_indices = @transform_2, window_bounds = array<i64: 1, 512>}, {transform_indices = @transform_3, window_bounds = array<i64: 1, 512>}]} {
    %c0 = arith.constant 0 : index
    %c0_0 = arith.constant 0 : index
    %0 = vector.load %arg1[%c0, %c0_0] : memref<1x256xf32, #tpu.memory_space<vmem>>, vector<1x256xf32>
    %c0_1 = arith.constant 0 : index
    %c0_2 = arith.constant 0 : index
    %1 = vector.load %arg2[%c0_1, %c0_2] : memref<256x512xf32, #tpu.memory_space<vmem>>, vector<256x512xf32>
    %cst = arith.constant dense<0.000000e+00> : vector<1x512xf32>
    %2 = tpu.matmul %0, %1, %cst {dimension_numbers = #tpu.dot_dimension_numbers<[1], [0], [0], [1], [0, 0, 1, 1], [], []>} : vector<1x256xf32>, vector<256x512xf32>, vector<1x512xf32> -> vector<1x512xf32>
    %c0_3 = arith.constant 0 : index
    %c0_4 = arith.constant 0 : index
    %3 = vector.load %arg3[%c0_3, %c0_4] : memref<1x512xf32, #tpu.memory_space<vmem>>, vector<1x512xf32>
    %4 = arith.addf %2, %3 : vector<1x512xf32>
    %c0_5 = arith.constant 0 : index
    %c0_6 = arith.constant 0 : index
    %5 = vector.load %arg4[%c0_5, %c0_6] : memref<1x512xf32, #tpu.memory_space<vmem>>, vector<1x512xf32>
    tpu.vector_store %arg4[%c0_5, %c0_6], %4 {strides = array<i32>} : memref<1x512xf32, #tpu.memory_space<vmem>>, vector<1x512xf32>,
    return
  }
  func.func @transform_0(%arg0: i32) -> (i32, i32) {
    %c0_i32 = arith.constant 0 : i32
    %c0_i32_0 = arith.constant 0 : i32
    return %arg0, %c0_i32 : i32, i32
  }
  func.func @transform_1(%arg0: i32) -> (i32, i32) {
    %c0_i32 = arith.constant 0 : i32
    %c0_i32_0 = arith.constant 0 : i32
    %c0_i32_1 = arith.constant 0 : i32
    return %c0_i32, %c0_i32_0 : i32, i32
  }
  func.func @transform_2(%arg0: i32) -> (i32, i32) {
    %c0_i32 = arith.constant 0 : i32
    %c0_i32_0 = arith.constant 0 : i32
    %c0_i32_1 = arith.constant 0 : i32
    return %c0_i32, %c0_i32_0 : i32, i32
  }
  func.func @transform_3(%arg0: i32) -> (i32, i32) {
    %c0_i32 = arith.constant 0 : i32
    %c0_i32_0 = arith.constant 0 : i32
    return %arg0, %c0_i32 : i32, i32
  }
}

</mosaic_0001>

<bundles_post_ra>
// kernel: input_highway_forward.1
= control target key start
LH: loop header
LB: loop body
LE: loop exit
PB: predicated region body
PF: predicated region fallthrough
CT: control target
= control target key end

     0   :  { %s916_s1 = inlined_call_operand.vmem [shape: f32[256,512], index: 1, kind: input, shape index: {}]   ;;  %s917_s0 = inlined_call_operand.vmem [shape: f32[1,256], index: 0, kind: input, shape index: {}]   ;;  %s918_s2 = inlined_call_operand.vmem [shape: f32[1,512], index: 2, kind: input, shape index: {}]   ;;  %s919_s3 = inlined_call_operand.vmem [shape: f32[1,512], index: 3, kind: output, shape index: {}]  }
   0x1   :  { %v16_v0 = vld [vmem:[%s916_s1 + $0x8] sm:$0xff]  ;;  %v18_v2 = vld [vmem:[%s916_s1 + $0x18] sm:$0xff]  ;;  %v15_v5 = vld [vmem:[%s916_s1] sm:$0xff] }
   0x2   :  { %v20_v1 = vld [vmem:[%s916_s1 + $0x28] sm:$0xff]  ;;  %v22_v4 = vld [vmem:[%s916_s1 + $0x38] sm:$0xff]  ;;  %v19_v6 = vld [vmem:[%s916_s1 + $0x20] sm:$0xff] }
   0x3   :  { %v356_v3 = vpack.c.bf16 %v20_v1, %v16_v0  ;;  %v420_v7 = vpack.c.bf16 %v22_v4, %v18_v2  ;;  %v358_v8 = vpack.c.bf16 %v19_v6, %v15_v5  ;;  %v17_v9 = vld [vmem:[%s916_s1 + $0x10] sm:$0xff]  ;;  %v24_v11 = vld [vmem:[%s916_s1 + $0x48] sm:$0xff]  ;;  %v26_v14 = vld [vmem:[%s916_s1 + $0x58] sm:$0xff] }
   0x4   :  { %v21_v10 = vld [vmem:[%s916_s1 + $0x30] sm:$0xff]  ;;  %v28_v13 = vld [vmem:[%s916_s1 + $0x68] sm:$0xff]  ;;  %v30_v15 = vld [vmem:[%s916_s1 + $0x78] sm:$0xff] }
   0x5   :  { %357 = vmatprep.subr.bf16.mxu0 %v356_v3  ;;  %v422_v12 = vpack.c.bf16 %v21_v10, %v17_v9  ;;  %421 = vmatprep.subr.bf16.mxu1 %v420_v7  ;;  %v360_v16 = vpack.c.bf16 %v28_v13, %v24_v11  ;;  %v424_v17 = vpack.c.bf16 %v30_v15, %v26_v14  ;;  %v23_v18 = vld [vmem:[%s916_s1 + $0x40] sm:$0xff]  ;;  %v25_v20 = vld [vmem:[%s916_s1 + $0x50] sm:$0xff]  ;;  %v32_v23 = vld [vmem:[%s916_s1 + $0x88] sm:$0xff] }
   0x6   :  { %359 = vmatpush1.bf16.msra.mxu0 %v358_v8  ;;  %v27_v19 = vld [vmem:[%s916_s1 + $0x60] sm:$0xff]  ;;  %v29_v22 = vld [vmem:[%s916_s1 + $0x70] sm:$0xff]  ;;  %v36_v24 = vld [vmem:[%s916_s1 + $0xa8] sm:$0xff] }
   0x7   :  { %423 = vmatpush1.bf16.msra.mxu1 %v422_v12  ;;  %v362_v21 = vpack.c.bf16 %v27_v19, %v23_v18  ;;  %361 = vmatprep.subr.bf16.mxu0 %v360_v16  ;;  %v426_v25 = vpack.c.bf16 %v29_v22, %v25_v20  ;;  %v364_v26 = vpack.c.bf16 %v36_v24, %v32_v23  ;;  %v34_v27 = vld [vmem:[%s916_s1 + $0x98] sm:$0xff]  ;;  %v31_v29 = vld [vmem:[%s916_s1 + $0x80] sm:$0xff]  ;;  %v33_v32 = vld [vmem:[%s916_s1 + $0x90] sm:$0xff] }
   0x8   :  { %425 = vmatprep.subr.bf16.mxu1 %v424_v17  ;;  %v38_v28 = vld [vmem:[%s916_s1 + $0xb8] sm:$0xff]  ;;  %v35_v31 = vld [vmem:[%s916_s1 + $0xa0] sm:$0xff]  ;;  %v37_v33 = vld [vmem:[%s916_s1 + $0xb0] sm:$0xff] }
   0x9   :  { %v428_v30 = vpack.c.bf16 %v38_v28, %v34_v27  ;;  %v366_v34 = vpack.c.bf16 %v35_v31, %v31_v29  ;;  %v40_v35 = vld [vmem:[%s916_s1 + $0xc8] sm:$0xff]  ;;  %v42_v37 = vld [vmem:[%s916_s1 + $0xd8] sm:$0xff]  ;;  %v430_v38 = vpack.c.bf16 %v37_v33, %v33_v32  ;;  %v39_v41 = vld [vmem:[%s916_s1 + $0xc0] sm:$0xff] }
   0xa   :  { %363 = vmatpush1.bf16.msra.mxu0 %v362_v21  ;;  %v44_v36 = vld [vmem:[%s916_s1 + $0xe8] sm:$0xff]  ;;  %v46_v40 = vld [vmem:[%s916_s1 + $0xf8] sm:$0xff]  ;;  %v43_v42 = vld [vmem:[%s916_s1 + $0xe0] sm:$0xff] }
   0xb   :  { %427 = vmatpush1.bf16.msra.mxu1 %v426_v25  ;;  %365 = vmatprep.subr.bf16.mxu0 %v364_v26  ;;  %v368_v39 = vpack.c.bf16 %v44_v36, %v40_v35  ;;  %v432_v43 = vpack.c.bf16 %v46_v40, %v42_v37  ;;  %v41_v44 = vld [vmem:[%s916_s1 + $0xd0] sm:$0xff]  ;;  %v48_v46 = vld [vmem:[%s916_s1 + $0x108] sm:$0xff]  ;;  %v50_v48 = vld [vmem:[%s916_s1 + $0x118] sm:$0xff]  ;;  %v370_v50 = vpack.c.bf16 %v43_v42, %v39_v41 }
   0xc   :  { %429 = vmatprep.subr.bf16.mxu1 %v428_v30  ;;  %v45_v45 = vld [vmem:[%s916_s1 + $0xf0] sm:$0xff]  ;;  %v52_v47 = vld [vmem:[%s916_s1 + $0x128] sm:$0xff]  ;;  %v54_v49 = vld [vmem:[%s916_s1 + $0x138] sm:$0xff] }
   0xd   :  { %v434_v51 = vpack.c.bf16 %v45_v45, %v41_v44  ;;  %v372_v52 = vpack.c.bf16 %v52_v47, %v48_v46  ;;  %v47_v53 = vld [vmem:[%s916_s1 + $0x100] sm:$0xff]  ;;  %v49_v55 = vld [vmem:[%s916_s1 + $0x110] sm:$0xff]  ;;  %v436_v56 = vpack.c.bf16 %v54_v49, %v50_v48  ;;  %v56_v58 = vld [vmem:[%s916_s1 + $0x148] sm:$0xff]  ;;  %v145_v46 = vlaneseq }
   0xe   :  { %367 = vmatpush1.bf16.msra.mxu0 %v366_v34  ;;  %v51_v54 = vld [vmem:[%s916_s1 + $0x120] sm:$0xff]  ;;  %v53_v57 = vld [vmem:[%s916_s1 + $0x130] sm:$0xff]  ;;  %v60_v59 = vld [vmem:[%s916_s1 + $0x168] sm:$0xff] }
   0xf   :  { %431 = vmatpush1.bf16.msra.mxu1 %v430_v38  ;;  %369 = vmatprep.subr.bf16.mxu0 %v368_v39  ;;  %v58_v60 = vld [vmem:[%s916_s1 + $0x158] sm:$0xff]  ;;  %v374_v62 = vpack.c.bf16 %v51_v54, %v47_v53  ;;  %v438_v63 = vpack.c.bf16 %v53_v57, %v49_v55  ;;  %v376_v0 = vpack.c.bf16 %v60_v59, %v56_v58  ;;  %v55_v1 = vld [vmem:[%s916_s1 + $0x140] sm:$0xff]  ;;  %v57_v3 = vld [vmem:[%s916_s1 + $0x150] sm:$0xff]  ;;  %v759_v59 = vshrl.u32 %v145_v46, 7 }
  0x10   :  { %433 = vmatprep.subr.bf16.mxu1 %v432_v43  ;;  %v62_v61 = vld [vmem:[%s916_s1 + $0x178] sm:$0xff]  ;;  %v59_v2 = vld [vmem:[%s916_s1 + $0x160] sm:$0xff]  ;;  %v61_v5 = vld [vmem:[%s916_s1 + $0x170] sm:$0xff]  ;;  %vm349_vm0 = vcmp.lt.s32.totalorder %v145_v46, 512 }
  0x11   :  { %v440_v4 = vpack.c.bf16 %v62_v61, %v58_v60  ;;  %v64_v6 = vld [vmem:[%s916_s1 + $0x188] sm:$0xff]  ;;  %v66_v8 = vld [vmem:[%s916_s1 + $0x198] sm:$0xff]  ;;  %v378_v10 = vpack.c.bf16 %v59_v2, %v55_v1  ;;  %v442_v11 = vpack.c.bf16 %v61_v5, %v57_v3  ;;  %v63_v13 = vld [vmem:[%s916_s1 + $0x180] sm:$0xff] }
  0x12   :  { %371 = vmatpush1.bf16.msra.mxu0 %v370_v50  ;;  %v68_v7 = vld [vmem:[%s916_s1 + $0x1a8] sm:$0xff]  ;;  %v70_v9 = vld [vmem:[%s916_s1 + $0x1b8] sm:$0xff]  ;;  %v67_v14 = vld [vmem:[%s916_s1 + $0x1a0] sm:$0xff] }
  0x13   :  { %435 = vmatpush1.bf16.msra.mxu1 %v434_v51  ;;  %373 = vmatprep.subr.bf16.mxu0 %v372_v52  ;;  %v380_v12 = vpack.c.bf16 %v68_v7, %v64_v6  ;;  %v65_v15 = vld [vmem:[%s916_s1 + $0x190] sm:$0xff]  ;;  %v444_v16 = vpack.c.bf16 %v70_v9, %v66_v8  ;;  %v72_v18 = vld [vmem:[%s916_s1 + $0x1c8] sm:$0xff]  ;;  %v74_v20 = vld [vmem:[%s916_s1 + $0x1d8] sm:$0xff]  ;;  %v382_v22 = vpack.c.bf16 %v67_v14, %v63_v13  ;;  %v151_v8 = vsub.s32 1, %v759_v59 }
  0x14   :  { %437 = vmatprep.subr.bf16.mxu1 %v436_v56  ;;  %v69_v17 = vld [vmem:[%s916_s1 + $0x1b0] sm:$0xff]  ;;  %v76_v19 = vld [vmem:[%s916_s1 + $0x1e8] sm:$0xff]  ;;  %v78_v21 = vld [vmem:[%s916_s1 + $0x1f8] sm:$0xff] }
  0x15   :  { %v446_v23 = vpack.c.bf16 %v69_v17, %v65_v15  ;;  %v384_v24 = vpack.c.bf16 %v76_v19, %v72_v18  ;;  %v71_v25 = vld [vmem:[%s916_s1 + $0x1c0] sm:$0xff]  ;;  %v73_v27 = vld [vmem:[%s916_s1 + $0x1d0] sm:$0xff]  ;;  %v448_v28 = vpack.c.bf16 %v78_v21, %v74_v20  ;;  %v80_v30 = vld [vmem:[%s916_s1 + $0x208] sm:$0xff] }
  0x16   :  { %375 = vmatpush1.bf16.msra.mxu0 %v374_v62  ;;  %v75_v26 = vld [vmem:[%s916_s1 + $0x1e0] sm:$0xff]  ;;  %v77_v29 = vld [vmem:[%s916_s1 + $0x1f0] sm:$0xff]  ;;  %v84_v31 = vld [vmem:[%s916_s1 + $0x228] sm:$0xff] }
  0x17   :  { %439 = vmatpush1.bf16.msra.mxu1 %v438_v63  ;;  %377 = vmatprep.subr.bf16.mxu0 %v376_v0  ;;  %v82_v32 = vld [vmem:[%s916_s1 + $0x218] sm:$0xff]  ;;  %v386_v34 = vpack.c.bf16 %v75_v26, %v71_v25  ;;  %v450_v35 = vpack.c.bf16 %v77_v29, %v73_v27  ;;  %v388_v36 = vpack.c.bf16 %v84_v31, %v80_v30  ;;  %v79_v37 = vld [vmem:[%s916_s1 + $0x200] sm:$0xff]  ;;  %v81_v39 = vld [vmem:[%s916_s1 + $0x210] sm:$0xff] }
  0x18   :  { %441 = vmatprep.subr.bf16.mxu1 %v440_v4  ;;  %v86_v33 = vld [vmem:[%s916_s1 + $0x238] sm:$0xff]  ;;  %v83_v38 = vld [vmem:[%s916_s1 + $0x220] sm:$0xff]  ;;  %v85_v41 = vld [vmem:[%s916_s1 + $0x230] sm:$0xff] }
  0x19   :  { %v452_v40 = vpack.c.bf16 %v86_v33, %v82_v32  ;;  %v88_v42 = vld [vmem:[%s916_s1 + $0x248] sm:$0xff]  ;;  %v90_v44 = vld [vmem:[%s916_s1 + $0x258] sm:$0xff]  ;;  %v390_v47 = vpack.c.bf16 %v83_v38, %v79_v37  ;;  %v454_v48 = vpack.c.bf16 %v85_v41, %v81_v39  ;;  %v87_v50 = vld [vmem:[%s916_s1 + $0x240] sm:$0xff] }
  0x1a   :  { %379 = vmatpush1.bf16.msra.mxu0 %v378_v10  ;;  %v92_v43 = vld [vmem:[%s916_s1 + $0x268] sm:$0xff]  ;;  %v94_v45 = vld [vmem:[%s916_s1 + $0x278] sm:$0xff]  ;;  %v91_v51 = vld [vmem:[%s916_s1 + $0x260] sm:$0xff] }
  0x1b   :  { %443 = vmatpush1.bf16.msra.mxu1 %v442_v11  ;;  %381 = vmatprep.subr.bf16.mxu0 %v380_v12  ;;  %v392_v49 = vpack.c.bf16 %v92_v43, %v88_v42  ;;  %v89_v52 = vld [vmem:[%s916_s1 + $0x250] sm:$0xff]  ;;  %v456_v53 = vpack.c.bf16 %v94_v45, %v90_v44  ;;  %v96_v55 = vld [vmem:[%s916_s1 + $0x288] sm:$0xff]  ;;  %v98_v57 = vld [vmem:[%s916_s1 + $0x298] sm:$0xff]  ;;  %v394_v60 = vpack.c.bf16 %v91_v51, %v87_v50 }
  0x1c   :  { %445 = vmatprep.subr.bf16.mxu1 %v444_v16  ;;  %v93_v54 = vld [vmem:[%s916_s1 + $0x270] sm:$0xff]  ;;  %v100_v56 = vld [vmem:[%s916_s1 + $0x2a8] sm:$0xff]  ;;  %v102_v58 = vld [vmem:[%s916_s1 + $0x2b8] sm:$0xff] }
  0x1d   :  { %v458_v61 = vpack.c.bf16 %v93_v54, %v89_v52  ;;  %v396_v62 = vpack.c.bf16 %v100_v56, %v96_v55  ;;  %v95_v63 = vld [vmem:[%s916_s1 + $0x280] sm:$0xff]  ;;  %v97_v1 = vld [vmem:[%s916_s1 + $0x290] sm:$0xff]  ;;  %v460_v2 = vpack.c.bf16 %v102_v58, %v98_v57  ;;  %v104_v4 = vld [vmem:[%s916_s1 + $0x2c8] sm:$0xff] }
  0x1e   :  { %383 = vmatpush1.bf16.msra.mxu0 %v382_v22  ;;  %v99_v0 = vld [vmem:[%s916_s1 + $0x2a0] sm:$0xff]  ;;  %v101_v3 = vld [vmem:[%s916_s1 + $0x2b0] sm:$0xff]  ;;  %v108_v5 = vld [vmem:[%s916_s1 + $0x2e8] sm:$0xff] }
  0x1f   :  { %447 = vmatpush1.bf16.msra.mxu1 %v446_v23  ;;  %385 = vmatprep.subr.bf16.mxu0 %v384_v24  ;;  %v106_v6 = vld [vmem:[%s916_s1 + $0x2d8] sm:$0xff]  ;;  %v398_v9 = vpack.c.bf16 %v99_v0, %v95_v63  ;;  %v103_v10 = vld [vmem:[%s916_s1 + $0x2c0] sm:$0xff]  ;;  %v462_v11 = vpack.c.bf16 %v101_v3, %v97_v1  ;;  %v400_v12 = vpack.c.bf16 %v108_v5, %v104_v4  ;;  %v105_v14 = vld [vmem:[%s916_s1 + $0x2d0] sm:$0xff]  ;;  %v147_v5 = vsub.s32 0, %v759_v59 }
  0x20   :  { %449 = vmatprep.subr.bf16.mxu1 %v448_v28  ;;  %v110_v7 = vld [vmem:[%s916_s1 + $0x2f8] sm:$0xff]  ;;  %v107_v13 = vld [vmem:[%s916_s1 + $0x2e0] sm:$0xff]  ;;  %v109_v15 = vld [vmem:[%s916_s1 + $0x2f0] sm:$0xff] }
  0x21   :  { %v464_v16 = vpack.c.bf16 %v110_v7, %v106_v6  ;;  %v112_v17 = vld [vmem:[%s916_s1 + $0x308] sm:$0xff]  ;;  %v807_v19 = vld [vmem:[%s917_s0] sm:$0x3]  ;;  %v114_v20 = vld [vmem:[%s916_s1 + $0x318] sm:$0xff]  ;;  %v402_v23 = vpack.c.bf16 %v107_v13, %v103_v10  ;;  %v466_v24 = vpack.c.bf16 %v109_v15, %v105_v14  ;;  %v170_v14 = vsub.s32 3, %v759_v59 }
  0x22   :  { %387 = vmatpush1.bf16.msra.mxu0 %v386_v34  ;;  %v116_v18 = vld [vmem:[%s916_s1 + $0x328] sm:$0xff]  ;;  %v118_v21 = vld [vmem:[%s916_s1 + $0x338] sm:$0xff]  ;;  %v152_v22 = vrot.slane %v807_v19, %v151_v8  ;;  %v111_v26 = vld [vmem:[%s916_s1 + $0x300] sm:$0xff] }
  0x23   :  { %451 = vmatpush1.bf16.msra.mxu1 %v450_v35  ;;  %389 = vmatprep.subr.bf16.mxu0 %v388_v36  ;;  %v404_v25 = vpack.c.bf16 %v116_v18, %v112_v17  ;;  %v115_v27 = vld [vmem:[%s916_s1 + $0x320] sm:$0xff]  ;;  %v113_v28 = vld [vmem:[%s916_s1 + $0x310] sm:$0xff]  ;;  %v468_v29 = vpack.c.bf16 %v118_v21, %v114_v20  ;;  %v120_v31 = vld [vmem:[%s916_s1 + $0x348] sm:$0xff] }
  0x24   :  { %453 = vmatprep.subr.bf16.mxu1 %v452_v40  ;;  %v117_v30 = vld [vmem:[%s916_s1 + $0x330] sm:$0xff]  ;;  %v124_v32 = vld [vmem:[%s916_s1 + $0x368] sm:$0xff]  ;;  %240 = vmatprep.mubr.f32.mxu0 %v152_v22  ;;  %v122_v33 = vld [vmem:[%s916_s1 + $0x358] sm:$0xff]  ;;  %v406_v35 = vpack.c.bf16 %v115_v27, %v111_v26 }
  0x25   :  { %v126_v34 = vld [vmem:[%s916_s1 + $0x378] sm:$0xff]  ;;  %311 = vmatprep.mubr.f32.mxu1 %v152_v22  ;;  %v470_v36 = vpack.c.bf16 %v117_v30, %v113_v28  ;;  %v408_v37 = vpack.c.bf16 %v124_v32, %v120_v31  ;;  %v119_v38 = vld [vmem:[%s916_s1 + $0x340] sm:$0xff]  ;;  %v121_v40 = vld [vmem:[%s916_s1 + $0x350] sm:$0xff] }
  0x26   :  { %391 = vmatpush1.bf16.msra.mxu0 %v390_v47  ;;  %v123_v39 = vld [vmem:[%s916_s1 + $0x360] sm:$0xff]  ;;  %v472_v41 = vpack.c.bf16 %v126_v34, %v122_v33  ;;  %v125_v42 = vld [vmem:[%s916_s1 + $0x370] sm:$0xff]  ;;  %v128_v43 = vld [vmem:[%s916_s1 + $0x388] sm:$0xff] }
  0x27   :  { %455 = vmatpush1.bf16.msra.mxu1 %v454_v48  ;;  %393 = vmatprep.subr.bf16.mxu0 %v392_v49  ;;  %v132_v44 = vld [vmem:[%s916_s1 + $0x3a8] sm:$0xff]  ;;  %v130_v45 = vld [vmem:[%s916_s1 + $0x398] sm:$0xff]  ;;  %v410_v48 = vpack.c.bf16 %v123_v39, %v119_v38  ;;  %v474_v49 = vpack.c.bf16 %v125_v42, %v121_v40  ;;  %v127_v51 = vld [vmem:[%s916_s1 + $0x380] sm:$0xff] }
  0x28   :  { %457 = vmatprep.subr.bf16.mxu1 %v456_v53  ;;  %v134_v47 = vld [vmem:[%s916_s1 + $0x3b8] sm:$0xff]  ;;  %v412_v50 = vpack.c.bf16 %v132_v44, %v128_v43  ;;  %v131_v52 = vld [vmem:[%s916_s1 + $0x3a0] sm:$0xff]  ;;  %v129_v53 = vld [vmem:[%s916_s1 + $0x390] sm:$0xff] }
  0x29   :  { %v476_v54 = vpack.c.bf16 %v134_v47, %v130_v45  ;;  %v133_v55 = vld [vmem:[%s916_s1 + $0x3b0] sm:$0xff]  ;;  %v136_v56 = vld [vmem:[%s916_s1 + $0x3c8] sm:$0xff]  ;;  %v138_v58 = vld [vmem:[%s916_s1 + $0x3d8] sm:$0xff] }
  0x2a   :  { %395 = vmatpush1.bf16.msra.mxu0 %v394_v60  ;;  %v140_v57 = vld [vmem:[%s916_s1 + $0x3e8] sm:$0xff]  ;;  %v142_v60 = vld [vmem:[%s916_s1 + $0x3f8] sm:$0xff]  ;;  %v135_v0 = vld [vmem:[%s916_s1 + $0x3c0] sm:$0xff] }
  0x2b   :  { %459 = vmatpush1.bf16.msra.mxu1 %v458_v61  ;;  %397 = vmatprep.subr.bf16.mxu0 %v396_v62  ;;  %v414_v61 = vpack.c.bf16 %v131_v52, %v127_v51  ;;  %v478_v62 = vpack.c.bf16 %v133_v55, %v129_v53  ;;  %v416_v63 = vpack.c.bf16 %v140_v57, %v136_v56  ;;  %v139_v1 = vld [vmem:[%s916_s1 + $0x3e0] sm:$0xff]  ;;  %v137_v3 = vld [vmem:[%s916_s1 + $0x3d0] sm:$0xff] }
  0x2c   :  { %461 = vmatprep.subr.bf16.mxu1 %v460_v2  ;;  %v480_v2 = vpack.c.bf16 %v142_v60, %v138_v58  ;;  %v141_v4 = vld [vmem:[%s916_s1 + $0x3f0] sm:$0xff]  ;;  %v418_v6 = vpack.c.bf16 %v139_v1, %v135_v0  ;;  %v143_v10 = vld [vmem:[%s918_s2] sm:$0xf] }
  0x2d   :  { %v482_v7 = vpack.c.bf16 %v141_v4, %v137_v3  ;;  %v159_v15 = vrot.slane %v143_v10, %v147_v5  ;;  %v163_v17 = vrot.slane %v143_v10, %v151_v8 }
  0x2e   :  { %399 = vmatpush1.bf16.msra.mxu0 %v398_v9  ;;  %v148_v9 = vrot.slane %v807_v19, %v147_v5  ;;  %v171_v19 = vrot.slane %v143_v10, %v170_v14 }
  0x2f   :  { %463 = vmatpush1.bf16.msra.mxu1 %v462_v11  ;;  %401 = vmatprep.subr.bf16.mxu0 %v400_v12  ;;  %v166_v11 = vsub.s32 2, %v759_v59  ;;  %v485_v12 = vmov 1966171168  }
  0x30   :  { %465 = vmatprep.subr.bf16.mxu1 %v464_v16  ;;  %v325_v13 = vunpack.c.l.s4 %v485_v12 }
  0x31   :  { %v167_v16 = vrot.slane %v143_v10, %v166_v11 }
  0x32   :  { %403 = vmatpush1.bf16.msra.mxu0 %v402_v23  ;;  %v326_v18 = vunpack.c.0.s8 %v325_v13 }
  0x33   :  { %467 = vmatpush1.bf16.msra.mxu1 %v466_v24  ;;  %405 = vmatprep.subr.bf16.mxu0 %v404_v25 }
  0x34   :  { %469 = vmatprep.subr.bf16.mxu1 %v468_v29  ;;  %v329_v26 = vsub.s32 %v326_v18, %v759_v59 }
  0x36   :  { %407 = vmatpush1.bf16.msra.mxu0 %v406_v35 }
  0x37   :  { %471 = vmatpush1.bf16.msra.mxu1 %v470_v36  ;;  %409 = vmatprep.subr.bf16.mxu0 %v408_v37 }
  0x38   :  { %473 = vmatprep.subr.bf16.mxu1 %v472_v41 }
  0x3a   :  { %411 = vmatpush1.bf16.msra.mxu0 %v410_v48 }
  0x3b   :  { %475 = vmatpush1.bf16.msra.mxu1 %v474_v49  ;;  %413 = vmatprep.subr.bf16.mxu0 %v412_v50 }
  0x3c   :  { %477 = vmatprep.subr.bf16.mxu1 %v476_v54 }
  0x3e   :  { %415 = vmatpush1.bf16.msra.mxu0 %v414_v61 }
  0x3f   :  { %479 = vmatpush1.bf16.msra.mxu1 %v478_v62  ;;  %417 = vmatprep.subr.bf16.mxu0 %v416_v63 }
  0x40   :  { %481 = vmatprep.subr.bf16.mxu1 %v480_v2 }
  0x42   :  { %419 = vmatpush1.bf16.msra.mxu0 %v418_v6 }
  0x43   :  { %483 = vmatpush1.bf16.msra.mxu1 %v482_v7 }
  0x45   :  { %241 = vmatmul.mubr.f32.vlgmr.msra.gmra.mrb[0].mxu0 %v148_v9 }
  0x46   :  { %312 = vmatmul.mubr.f32.vlgmr.msra.gmra.mrb[0].mxu1 %v148_v9 }
 0x118   :  { %v242_v20 = vpop.f32.mrb[0].mxu0 }
 0x119   :  { %v243_v21 = vadd.f32 %v242_v20, %v159_v15  ;;  %v313_v22 = vpop.f32.mrb[0].mxu1  ;;  %v244_v23 = vpop.f32.mrb[1].mxu0 }
 0x11a   :  { %v314_v24 = vadd.f32 %v313_v22, %v167_v16  ;;  %v245_v25 = vadd.f32 %v244_v23, %v163_v17  ;;  %v315_v27 = vpop.f32.mrb[1].mxu1 }
 0x11b   :  { %v316_v28 = vadd.f32 %v315_v27, %v171_v19 }
 0x11c   :  { %v322_v29 = vcombine.low %v243_v21, %v245_v25 }
 0x11d   :  { %v323_v30 = vcombine.low %v314_v24, %v316_v28 }
 0x11e   :  { %v330_v31 = vrot.slane %v322_v29, %v329_v26 }
 0x11f   :  { %v337_v32 = vrot.slane %v323_v30, %v329_v26 }
 0x121   :  { %v338_v33 = vcombine.low %v330_v31, %v337_v32 }
 0x123   :  { %v345_v8 = vrot.slane %v338_v33, %v329_v26 }
 0x125   :  { %351 = vst.msk [vmem:[%s919_s3] sm:$0xf] %vm349_vm0, %v345_v8 }

</bundles_post_ra>
